<compile_context>
chip_gen: v7x
topology: tpu7x:2x2x1
jax: 0.10.0
libtpu: 0.0.40
codegen_flags: <defaults>
</compile_context>

<pallas_src>
import math
import numpy as np
import jax
import jax.numpy as jnp
from jax.experimental import pallas as pl
from jax.experimental.pallas import tpu as pltpu


# ----------------------------- Pallas kernel -------------------------------

def _conv3x3_bn_silu_kernel(x_ref, w_ref, b_ref, o_ref):
    """3x3 conv (stride 1, pad 1) + folded-BN bias + SiLU for one H-tile.

    x_ref: (1, H+2, W+2, Cin) bf16  spatially padded NHWC image (VMEM resident
                                    across the inner h grid axis)
    w_ref: (9*Cin, Cout)      bf16  BN-folded weight, k = (kh*3 + kw)*Cin + ci
    b_ref: (1, Cout)          f32   BN shift
    o_ref: (1, TH, W, Cout)   bf16  output row tile
    """
    _, TH, W, Cout = o_ref.shape
    Cin = x_ref.shape[3]
    h = pl.program_id(1)

    row0 = h * TH
    if TH % 8 == 0:
        row0 = pl.multiple_of(row0, 8)
    # Slice the halo rows for this tile (leading, untiled axis -> cheap).
    xs = x_ref[0, pl.ds(row0, TH + 2), :, :]                    # (TH+2, W+2, Cin)

    # W-direction im2col, built ONCE and reused for the 3 kh shifts.
    xw = jnp.concatenate([xs[:, kw:kw + W, :] for kw in range(3)],
                         axis=-1)                               # (TH+2, W, 3*Cin)
    # kh shifts slice the untiled leading axis; TH*W % 8 == 0 keeps the reshape
    # a no-op view.
    patches = jnp.concatenate(
        [xw[kh:kh + TH].reshape(TH * W, 3 * Cin) for kh in range(3)],
        axis=-1)                                                # (TH*W, 9*Cin)

    # One K = 9*Cin MXU dot, f32 accumulation.
    y = jnp.dot(patches, w_ref[...], preferred_element_type=jnp.float32)
    y = y + b_ref[...]                                          # fused BN (eval) bias

    # Numerically-stable SiLU: y * sigmoid(y).
    z = jnp.exp(-jnp.abs(y))
    y = y * (jnp.where(y >= 0, 1.0, z) / (1.0 + z))

    o_ref[...] = y.reshape(1, TH, W, Cout).astype(o_ref.dtype)


def _vmem_limit_bytes():
    # Raise the scoped-VMEM ceiling above the default on v4/v5e/v6e (128 MiB
    # physical); stay conservative on v7x (64 MiB physical per TensorCore).
    try:
        kind = jax.devices()[0].device_kind.lower()
    except Exception:
        kind = ""
    if "v7" in kind:
        return 48 * 1024 * 1024
    return 64 * 1024 * 1024


def _pick_block_h(H, W, Cin, budget_bytes=2 << 20):
    """Largest TH dividing H with TH*W sublane-aligned and a bounded im2col tile."""
    best = None
    for th in range(1, H + 1):
        if H % th:
            continue
        if (th * W) % 8 and th != H:
            continue            # keep (TH*W, .) <-> (TH, W, .) reshapes as views
        if best is not None and th * W * 9 * Cin * 2 > budget_bytes:
            break
        best = th
    return best if best is not None else H


def orepa_conv_bn_silu_nhwc(x_nhwc, weight_oihw, bn_scale, bn_shift, *, block_h=None):
    """3x3 conv (stride=1, pad=1, dilation=1, groups=1) + BN(eval) + SiLU. NHWC in/out."""
    N, H, W, Cin = x_nhwc.shape
    Cout, Cin_w, KH, KW = weight_oihw.shape
    assert (KH, KW) == (3, 3) and Cin_w == Cin  # stride=1, pad=1, groups=1 only

    TH = _pick_block_h(H, W, Cin) if block_h is None else block_h
    assert H % TH == 0

    # Fold BN scale into the weight in f32, reorder once to the kernel's
    # contraction layout k = (kh*3 + kw)*Cin + ci, then cast to bf16.
    w_f = weight_oihw.astype(jnp.float32) * bn_scale.astype(jnp.float32)[:, None, None, None]
    w_mat = jnp.transpose(w_f, (2, 3, 1, 0)).reshape(9 * Cin, Cout).astype(jnp.bfloat16)
    bias = bn_shift.astype(jnp.float32).reshape(1, Cout)

    # Single wrapper-side layout op: 1-pixel halo pad fused with the bf16 cast.
    # TODO(synk): for very large activations, move the halo into the kernel via
    # overlapping-row DMA so this extra pass over the input disappears too.
    x_pad = jnp.pad(x_nhwc.astype(jnp.bfloat16), ((0, 0), (1, 1), (1, 1), (0, 0)))

    cost = pl.CostEstimate(
        flops=2 * N * H * W * 9 * Cin * Cout,
        transcendentals=N * H * W * Cout,
        bytes_accessed=(N * (H + 2) * (W + 2) * Cin * 2
                        + 9 * Cin * Cout * 2 + Cout * 4
                        + N * H * W * Cout * 2),
    )

    return pl.pallas_call(
        _conv3x3_bn_silu_kernel,
        out_shape=jax.ShapeDtypeStruct((N, H, W, Cout), jnp.bfloat16),
        grid_spec=pltpu.PrefetchScalarGridSpec(
            num_scalar_prefetch=0,
            grid=(N, H // TH),
            in_specs=[
                # Whole padded image; block index is h-invariant -> stays VMEM
                # resident across the inner h axis (no re-DMA per row tile).
                pl.BlockSpec((1, H + 2, W + 2, Cin), lambda n, h: (n, 0, 0, 0)),
                pl.BlockSpec((9 * Cin, Cout), lambda n, h: (0, 0)),   # resident
                pl.BlockSpec((1, Cout), lambda n, h: (0, 0)),         # resident
            ],
            out_specs=pl.BlockSpec((1, TH, W, Cout), lambda n, h: (n, h, 0, 0)),
        ),
        compiler_params=pltpu.CompilerParams(
            dimension_semantics=("parallel", "parallel"),
            vmem_limit_bytes=_vmem_limit_bytes(),
        ),
        cost_estimate=cost,
    )(x_pad, w_mat, bias)


def orepa_forward_nchw(x_nchw, weight, bn_scale, bn_shift, *, block_h=None):
    """NCHW adapter matching the PyTorch module interface.

    The Pallas path is NHWC-native; these two transposes are interface glue for
    the NCHW PyTorch spec and vanish in an NHWC end-to-end network.
    """
    x_nhwc = jnp.transpose(x_nchw, (0, 2, 3, 1))
    y = orepa_conv_bn_silu_nhwc(x_nhwc, weight, bn_scale, bn_shift, block_h=block_h)
    return jnp.transpose(y, (0, 3, 1, 2))


# -------------------- parameter init (mirrors __init__) --------------------

def _kaiming_uniform(key, shape, a):
    fan_in = int(np.prod(shape[1:]))
    gain = math.sqrt(2.0 / (1.0 + a * a))
    bound = gain * math.sqrt(3.0 / fan_in)
    return jax.random.uniform(key, shape, jnp.float32, -bound, bound)


def make_orepa_params(key, in_channels, out_channels, kernel_size=3, expand=8):
    assert in_channels == out_channels, "example uses idconv + identity branch"
    ks = kernel_size
    keys = jax.random.split(key, 6)
    p = {}
    p["w_origin"] = _kaiming_uniform(keys[0], (out_channels, in_channels, ks, ks), math.sqrt(1.0))
    p["w_avg_conv"] = _kaiming_uniform(keys[1], (out_channels, in_channels, 1, 1), 1.0)
    p["w_pfir_conv"] = _kaiming_uniform(keys[2], (out_channels, in_channels, 1, 1), 1.0)
    p["avg_avg"] = jnp.full((ks, ks), 1.0 / (ks * ks), jnp.float32)

    # fre_init prior buffer
    prior = np.zeros((out_channels, ks, ks), dtype=np.float32)
    half_fg = out_channels / 2
    for i in range(out_channels):
        for h in range(3):
            for w in range(3):
                if i < half_fg:
                    prior[i, h, w] = math.cos(math.pi * (h + 0.5) * (i + 1) / 3)
                else:
                    prior[i, h, w] = math.cos(math.pi * (w + 0.5) * (i + 1 - half_fg) / 3)
    p["prior"] = jnp.asarray(prior)

    # 1x1-kxk branch (internal_channels == in_channels -> idconv path)
    p["idconv1"] = jnp.zeros((in_channels, in_channels, 1, 1), jnp.float32)
    id_value = np.zeros((in_channels, in_channels, 1, 1), dtype=np.float32)
    for i in range(in_channels):
        id_value[i, i % in_channels, 0, 0] = 1.0
    p["id_tensor"] = jnp.asarray(id_value)
    p["conv2"] = _kaiming_uniform(keys[3], (out_channels, in_channels, ks, ks), math.sqrt(1.0))

    # depthwise-separable (gconv) branch
    p["gconv_dw"] = _kaiming_uniform(keys[4], (in_channels * expand, 1, ks, ks), math.sqrt(1.0))
    p["gconv_pw"] = _kaiming_uniform(keys[5], (out_channels, in_channels * expand, 1, 1), math.sqrt(1.0))

    # branch mixing vector (rows 0..4 as in init.constant_; row 5 unused)
    vec = np.zeros((6, out_channels), dtype=np.float32)
    vec[0, :] = 0.25
    vec[1, :] = 0.25
    vec[2, :] = 0.0
    vec[3, :] = 0.5
    vec[4, :] = 0.5
    p["vector"] = jnp.asarray(vec)

    # BatchNorm2d (eval-mode defaults): gamma=1, beta=0, mean=0, var=1, eps=1e-5
    eps = 1e-5
    p["bn_scale"] = jnp.ones((out_channels,), jnp.float32) / jnp.sqrt(1.0 + eps)
    p["bn_shift"] = jnp.zeros((out_channels,), jnp.float32)
    return p


def weight_gen(p):
    """Mirror of OREPA_3x3_RepVGG.weight_gen (groups=1, idconv branch)."""
    vec = p["vector"]
    w_origin = p["w_origin"] * vec[0][:, None, None, None]
    w_avg = (p["w_avg_conv"] * p["avg_avg"][None, None, :, :]) * vec[1][:, None, None, None]
    w_pfir = (p["w_pfir_conv"] * p["prior"][:, None, :, :]) * vec[2][:, None, None, None]
    conv1 = (p["idconv1"] + p["id_tensor"])[:, :, 0, 0]                 # (Cin, Cin)
    w_1x1_kxk = jnp.einsum("ti,othw->oihw", conv1, p["conv2"]) * vec[3][:, None, None, None]
    cin = p["idconv1"].shape[0]
    cout = p["conv2"].shape[0]
    dw = p["gconv_dw"].reshape(cin, 8, 1, 3, 3)
    pw = p["gconv_pw"][:, :, 0, 0].reshape(cout, cin, 8)
    w_gconv = jnp.einsum("gtihw,ogt->ogihw", dw, pw).reshape(cout, cin, 3, 3)
    w_gconv = w_gconv * vec[4][:, None, None, None]
    return w_origin + w_avg + w_1x1_kxk + w_pfir + w_gconv


# ------------------------------ reference ----------------------------------

def reference_forward(x_nchw, weight, bn_scale, bn_shift):
    """Reference matching the kernel's precision choices: bf16-rounded
    activations and bf16-rounded BN-folded weight, f32 conv accumulate."""
    xq = x_nchw.astype(jnp.bfloat16).astype(jnp.float32)
    wq = (weight.astype(jnp.float32) * bn_scale[:, None, None, None])
    wq = wq.astype(jnp.bfloat16).astype(jnp.float32)
    y = jax.lax.conv_general_dilated(
        xq, wq, window_strides=(1, 1), padding=((1, 1), (1, 1)),
        dimension_numbers=("NCHW", "OIHW", "NCHW"))
    y = y + bn_shift[None, :, None, None]
    return y * jax.nn.sigmoid(y)


# --------------------------------- main -------------------------------------

if __name__ == "__main__":
    key = jax.random.PRNGKey(0)
    k_x, k_p = jax.random.split(key)

    N, C, H, W = 2, 4, 16, 16
    x = jax.random.normal(k_x, (N, C, H, W), jnp.float32)

    params = make_orepa_params(k_p, in_channels=C, out_channels=C)
    weight = weight_gen(params)                       # (Cout, Cin, 3, 3)

    # block_h=8 exercises the (N, H//TH) grid (2 row tiles per image).
    out = orepa_forward_nchw(x, weight, params["bn_scale"], params["bn_shift"],
                             block_h=8)
    out = jax.block_until_ready(out)

    ref = jax.block_until_ready(
        reference_forward(x, weight, params["bn_scale"], params["bn_shift"]))

    # TODO(synk): BatchNorm is applied with eval-mode running stats (fresh
    # defaults); training-mode batch statistics are not reproduced here.
    assert out.shape == (N, C, H, W)
    out_f32 = np.asarray(out.astype(jnp.float32))
    ref_f32 = np.asarray(ref)
    # Tolerance covers bf16 input/weight/output rounding and accumulation-order
    # differences (inputs/weights are matched in bf16 precision in the ref).
    assert np.allclose(out_f32, ref_f32, atol=3e-2, rtol=3e-2), \
        float(np.max(np.abs(out_f32 - ref_f32)))
    print("KERNEL_OK")
</pallas_src>

<mosaic_0001>
module attributes {stable_mosaic.version = 11 : i64} {
  func.func @_conv3x3_bn_silu_kernel(%arg0: i32, %arg1: i32, %arg2: memref<1x18x18x4xbf16, #tpu.memory_space<vmem>>, %arg3: memref<36x4xbf16, #tpu.memory_space<vmem>>, %arg4: memref<1x4xf32, #tpu.memory_space<vmem>>, %arg5: memref<1x8x16x4xbf16, #tpu.memory_space<vmem>>) attributes {dimension_semantics = [#tpu.dimension_semantics<parallel>, #tpu.dimension_semantics<parallel>], iteration_bounds = array<i64: 2, 2>, scalar_prefetch = 0 : i64, scratch_operands = 0 : i64, tpu.core_type = #tpu.core_type<tc>, window_params = [{transform_indices = @transform_0, window_bounds = array<i64: 1, 18, 18, 4>}, {pipeline_mode = #tpu.pipeline_mode<synchronous>, transform_indices = @transform_1, window_bounds = array<i64: 36, 4>}, {pipeline_mode = #tpu.pipeline_mode<synchronous>, transform_indices = @transform_2, window_bounds = array<i64: 1, 4>}, {transform_indices = @transform_3, window_bounds = array<i64: 1, 8, 16, 4>}]} {
    %c8_i32 = arith.constant 8 : i32
    %0 = arith.muli %arg1, %c8_i32 : i32
    %1 = tpu.assume_multiple %0, 8 : i32
    %c0 = arith.constant 0 : index
    %2 = arith.index_cast %1 : i32 to index
    %c0_0 = arith.constant 0 : index
    %c0_1 = arith.constant 0 : index
    %3 = vector.load %arg2[%c0, %2, %c0_0, %c0_1] : memref<1x18x18x4xbf16, #tpu.memory_space<vmem>>, vector<1x10x18x4xbf16>
    %4 = vector.shape_cast %3 : vector<1x10x18x4xbf16> to vector<10x18x4xbf16>
    %5 = vector.extract_strided_slice %4 {offsets = [0, 0, 0], sizes = [10, 16, 4], strides = [1, 1, 1]} : vector<10x18x4xbf16> to vector<10x16x4xbf16>
    %6 = vector.extract_strided_slice %4 {offsets = [0, 1, 0], sizes = [10, 16, 4], strides = [1, 1, 1]} : vector<10x18x4xbf16> to vector<10x16x4xbf16>
    %7 = vector.extract_strided_slice %4 {offsets = [0, 2, 0], sizes = [10, 16, 4], strides = [1, 1, 1]} : vector<10x18x4xbf16> to vector<10x16x4xbf16>
    %8 = tpu.concatenate %5, %6, %7 in 2 : vector<10x16x4xbf16>, vector<10x16x4xbf16>, vector<10x16x4xbf16> -> vector<10x16x12xbf16>
    %9 = vector.extract_strided_slice %8 {offsets = [0, 0, 0], sizes = [8, 16, 12], strides = [1, 1, 1]} : vector<10x16x12xbf16> to vector<8x16x12xbf16>
    %10 = vector.shape_cast %9 : vector<8x16x12xbf16> to vector<128x12xbf16>
    %11 = vector.extract_strided_slice %8 {offsets = [1, 0, 0], sizes = [8, 16, 12], strides = [1, 1, 1]} : vector<10x16x12xbf16> to vector<8x16x12xbf16>
    %12 = vector.shape_cast %11 : vector<8x16x12xbf16> to vector<128x12xbf16>
    %13 = vector.extract_strided_slice %8 {offsets = [2, 0, 0], sizes = [8, 16, 12], strides = [1, 1, 1]} : vector<10x16x12xbf16> to vector<8x16x12xbf16>
    %14 = vector.shape_cast %13 : vector<8x16x12xbf16> to vector<128x12xbf16>
    %15 = tpu.concatenate %10, %12, %14 in 1 : vector<128x12xbf16>, vector<128x12xbf16>, vector<128x12xbf16> -> vector<128x36xbf16>
    %c0_2 = arith.constant 0 : index
    %c0_3 = arith.constant 0 : index
    %16 = vector.load %arg3[%c0_2, %c0_3] : memref<36x4xbf16, #tpu.memory_space<vmem>>, vector<36x4xbf16>
    %cst = arith.constant dense<0.000000e+00> : vector<128x4xf32>
    %17 = tpu.matmul %15, %16, %cst {dimension_numbers = #tpu.dot_dimension_numbers<[1], [0], [0], [1], [0, 0, 1, 1], [], []>} : vector<128x36xbf16>, vector<36x4xbf16>, vector<128x4xf32> -> vector<128x4xf32>
    %c0_4 = arith.constant 0 : index
    %c0_5 = arith.constant 0 : index
    %18 = vector.load %arg4[%c0_4, %c0_5] : memref<1x4xf32, #tpu.memory_space<vmem>>, vector<1x4xf32>
    %19 = vector.broadcast %18 : vector<1x4xf32> to vector<128x4xf32>
    %20 = arith.addf %17, %19 : vector<128x4xf32>
    %21 = math.absf %20 : vector<128x4xf32>
    %cst_6 = arith.constant 0.000000e+00 : f32
    %22 = vector.broadcast %cst_6 : f32 to vector<128x4xf32>
    %23 = arith.subf %22, %21 : vector<128x4xf32>
    %24 = math.exp %23 : vector<128x4xf32>
    %cst_7 = arith.constant 0.000000e+00 : f32
    %25 = vector.broadcast %cst_7 : f32 to vector<128x4xf32>
    %26 = arith.cmpf oge, %20, %25 : vector<128x4xf32>
    %cst_8 = arith.constant 1.000000e+00 : f32
    %27 = vector.broadcast %cst_8 : f32 to vector<128x4xf32>
    %28 = arith.select %26, %27, %24 : vector<128x4xi1>, vector<128x4xf32>
    %cst_9 = arith.constant 1.000000e+00 : f32
    %29 = vector.broadcast %cst_9 : f32 to vector<128x4xf32>
    %30 = arith.addf %29, %24 : vector<128x4xf32>
    %31 = arith.divf %28, %30 : vector<128x4xf32>
    %32 = arith.mulf %20, %31 : vector<128x4xf32>
    %33 = vector.shape_cast %32 : vector<128x4xf32> to vector<1x8x16x4xf32>
    %34 = arith.truncf %33 : vector<1x8x16x4xf32> to vector<1x8x16x4xbf16>
    %c0_10 = arith.constant 0 : index
    %c0_11 = arith.constant 0 : index
    %c0_12 = arith.constant 0 : index
    %c0_13 = arith.constant 0 : index
    %35 = vector.load %arg5[%c0_10, %c0_11, %c0_12, %c0_13] : memref<1x8x16x4xbf16, #tpu.memory_space<vmem>>, vector<1x8x16x4xbf16>
    tpu.vector_store %arg5[%c0_10, %c0_11, %c0_12, %c0_13], %34 {strides = array<i32>} : memref<1x8x16x4xbf16, #tpu.memory_space<vmem>>, vector<1x8x16x4xbf16>,
    return
  }
  func.func @transform_0(%arg0: i32, %arg1: i32) -> (i32, i32, i32, i32) {
    %c0_i32 = arith.constant 0 : i32
    %c0_i32_0 = arith.constant 0 : i32
    %c0_i32_1 = arith.constant 0 : i32
    %c0_i32_2 = arith.constant 0 : i32
    return %arg0, %c0_i32, %c0_i32_0, %c0_i32_1 : i32, i32, i32, i32
  }
  func.func @transform_1(%arg0: i32, %arg1: i32) -> (i32, i32) {
    %c0_i32 = arith.constant 0 : i32
    %c0_i32_0 = arith.constant 0 : i32
    %c0_i32_1 = arith.constant 0 : i32
    return %c0_i32, %c0_i32_0 : i32, i32
  }
  func.func @transform_2(%arg0: i32, %arg1: i32) -> (i32, i32) {
    %c0_i32 = arith.constant 0 : i32
    %c0_i32_0 = arith.constant 0 : i32
    %c0_i32_1 = arith.constant 0 : i32
    return %c0_i32, %c0_i32_0 : i32, i32
  }
  func.func @transform_3(%arg0: i32, %arg1: i32) -> (i32, i32, i32, i32) {
    %c0_i32 = arith.constant 0 : i32
    %c0_i32_0 = arith.constant 0 : i32
    %c0_i32_1 = arith.constant 0 : i32
    return %arg0, %arg1, %c0_i32, %c0_i32_0 : i32, i32, i32, i32
  }
}

</mosaic_0001>

<bundles_post_ra>
// kernel: tpu_custom_call.1
= control target key start
LH: loop header
LB: loop body
LE: loop exit
PB: predicated region body
PF: predicated region fallthrough
CT: control target
= control target key end

     0   :  { %s2440_s0 = inlined_call_operand.hbm [shape: bf16[2,18,18,4], index: 0, kind: input, shape index: {}]   ;;  %s2441_s1 = inlined_call_operand.hbm [shape: bf16[36,4], index: 1, kind: input, shape index: {}]   ;;  %s2442_s2 = inlined_call_operand.hbm [shape: f32[1,4], index: 2, kind: input, shape index: {}]   ;;  %s2443_s3 = inlined_call_operand.hbm [shape: bf16[2,16,16,4], index: 3, kind: output, shape index: {}]  }
   0x1   :  { %2455 = sst [smem:[#allocation16_spill]] %s2441_s1 }
   0x2   :  { %2456 = sst [smem:[#allocation17_spill]] %s2442_s2 }
   0x3   :  { %8 = vsyncpa [#allocation3], 0 }
   0x4   :  { %10 = vsyncpa [#allocation3 + $0x1], 0 }
   0x5   :  { %11 = vsyncpa [#allocation6], 0 }
   0x6   :  { %12 = vsyncpa [#allocation4], 0 }
   0x7   :  { %14 = vsyncpa [#allocation4 + $0x1], 0  ;;  %s1759_s12 = smov 0   ;;  %s1761_s13 = smov 0  }
   0x8   :  { %s1763_s14 = smov 0   ;;  %s1765_s15 = smov 0  }
   0x9   :  { %s1767_s16 = smov 0   ;;  %s1769_s17 = smov 0  }
   0xa   :  { %s1771_s18 = smov 0   ;;  %s1773_s19 = smov 0  }
   0xb   :  { %s1775_s20 = smov 0   ;;  %s1777_s21 = smov 0  }
   0xc   :  { %s1779_s22 = smov 0  }
   0xd LB: > { %2457 = sst [smem:[#allocation12_spill]] %s1686_s12  ;;  %s1166_s23 = sadd.s32 4294967295, %s1726_s22   ;;  %s1726_s22 = sphi %s1779_s22, %s20_s22   ;;  %s1722_s21 = sphi %s1777_s21, %s2491_s21   ;;  %s1718_s20 = sphi %s1775_s20, %s2482_s20   ;;  %s1714_s19 = sphi %s1773_s19, %s2490_s19   ;;  %s1710_s18 = sphi %s1771_s18, %s2481_s18   ;;  %s1706_s17 = sphi %s1769_s17, %s2489_s17   ;;  %s1702_s16 = sphi %s1767_s16, %s2488_s16   ;;  %s1698_s15 = sphi %s1765_s15, %s2487_s15   ;;  %s1694_s14 = sphi %s1763_s14, %s2486_s14   ;;  %s1690_s13 = sphi %s1761_s13, %s2485_s13   ;;  %s1686_s12 = sphi %s1759_s12, %s2484_s12  }
   0xe   : > { %2458 = sst [smem:[#allocation13_spill]] %s1718_s20  ;;  %s1167_s24 = sadd.s32 4294967294, %s1726_s22  }
   0xf   : > { %p52_p0 = scmp.ne.s32.totalorder %s1702_s16, %s1698_s15  ;;  %p1815_p1 = scmp.eq.s32.totalorder %s1166_s23, 0 }
  0x10   : > { %p119_p2 = scmp.ne.s32.totalorder %s1694_s14, %s1690_s13  ;;  %p120_p4 = scmp.eq.s32.totalorder %s1166_s23, 3 }
  0x11   : > { %s2459_s25 = scalar_select %p1815_p1, 1, 0 }
  0x12   : > { %p1824_p3 = por %p1815_p1, %p52_p0  ;;  %p125_p5 = scmp.ne.s32.totalorder %s1690_s13, %s1686_s12 }
  0x13   : > { %p126_p6 = scmp.eq.s32.totalorder %s1167_s24, 3  ;;  %p1830_p7 = por %p120_p4, %p119_p2 }
  0x14   : > { %s2460_s27 = scalar_select %p1824_p3, 1, 0 }
  0x15   : > { %s2461_s28 = scalar_select %p1830_p7, 1, 0 }
  0x16   : > { %p1168_p8 = scmp.ge.s32.totalorder %s1726_s22, 1  ;;  %p1835_p9 = por %p126_p6, %p125_p5 }
  0x17   : > { %p133_p10 = scmp.lt.s32.totalorder %s1726_s22, 5  ;;  %s1728_s4 = smov [#allocation5]  }
  0x18   : > { %s2462_s29 = scalar_select %p1835_p9, 1, 0 }
  0x19   : > { %p1840_p11 = pnand %p1168_p8, %p133_p10  ;;  %s145_s5 = sshll.u32 %s1728_s4, 4  ;;  %s146_s5 = int_to_ptr.vmem [resolvable:$true] %s145_s5 }
  0x1a   : > { %2463 = sst [smem:[#allocation14_spill]] %s2462_s29  ;;  %s1729_s7 = smov [#allocation7]  }
  0x1b   : > { %s2464_s30 = scalar_select %p1840_p11, 1, 0 }
  0x1c   : > { %p1309_p12 = pneg %p1840_p11  ;;  %s159_s8 = sshll.u32 %s1729_s7, 4  ;;  %s1852_s8 = int_to_ptr.vmem [resolvable:$true] %s159_s8 }
  0x1d   : > { %s2466_s1 = sld [smem:[#allocation16_spill]] }
  0x1e   : > { %p1848_p13 = pnand %p1309_p12, %p1815_p1 }
  0x20   : > { %p1516_p2 = pneg %p1848_p13 }
  0x23   : > { %s1514_s11 = scalar_lea.hbm %s2466_s1, 320 }
  0x24   : > { %p1515_p0 = scmp.ne.s32.totalorder %s2466_s1, %s1514_s11  ;;  %p1521_p6 = scmp.lt.u32.totalorder %s1514_s11, %s2466_s1 }
  0x26   : > { %p1517_p4 = pnand %p1516_p2, %p1515_p0 }
  0x28   : > { %p1518_p5 = pneg %p1517_p4 }
  0x2a   : > { %p1523_p8 = pnand %p1521_p6, %p1518_p5 }
  0x2c   : > { %1526 = shalt.err (!%p1523_p8)
}
  0x2d   : > { %s1527_s7 = scalar_lea.vmem %s146_s5, 320  ;;  %p1535_p7 = scmp.lt.s32.totalorder %s146_s5, %s146_s5 }
  0x2e   : > { %p1528_p10 = scmp.ne.s32.totalorder %s146_s5, %s1527_s7  ;;  %p1536_p1 = scmp.lt.s32.totalorder %s1527_s7, %s1527_s7 }
  0x30   : > { %p1530_p12 = pnand %p1528_p10, %p1516_p2  ;;  %p1537_p3 = por %p1536_p1, %p1535_p7 }
  0x32   : > { %p1531_p9 = pneg %p1530_p12 }
  0x34   : > { %p1538_p11 = pnand %p1537_p3, %p1531_p9 }
  0x36   : > { %1541 = shalt.err (!%p1538_p11)
}
  0x37   : > { %s2451_s9 = smov 64   ;;  %s2452_s10 = smov 4  }
  0x38   : > { %1312 = dma.hbm_to_vmem [thread:$0]  (!%p1848_p13), %s2466_s1, 320, %s146_s5, [#allocation6], %s2451_s9, %s2451_s9, %s2452_s10  }
  0x39   : > { %s2467_s2 = sld [smem:[#allocation17_spill]] }
  0x3f   : > { %s1542_s4 = scalar_lea.hbm %s2467_s2, 16 }
  0x40   : > { %p1543_p1 = scmp.ne.s32.totalorder %s2467_s2, %s1542_s4  ;;  %p1549_p9 = scmp.lt.u32.totalorder %s1542_s4, %s2467_s2 }
  0x42   : > { %p1545_p3 = pnand %p1543_p1, %p1516_p2 }
  0x44   : > { %p1546_p7 = pneg %p1545_p3 }
  0x46   : > { %p1551_p11 = pnand %p1549_p9, %p1546_p7 }
  0x48   : > { %1554 = shalt.err (!%p1551_p11)
}
  0x49   : > { %s1555_s5 = scalar_lea.vmem %s1852_s8, 16  ;;  %s1562_s26 = scalar_lea.vmem %s1852_s8, 32 }
  0x4a   : > { %p1556_p0 = scmp.ne.s32.totalorder %s1852_s8, %s1555_s5  ;;  %p1563_p6 = scmp.lt.s32.totalorder %s1852_s8, %s1852_s8 }
  0x4b   : > { %p1564_p8 = scmp.lt.s32.totalorder %s1562_s26, %s1555_s5 }
  0x4c   : > { %p1558_p4 = pnand %p1556_p0, %p1516_p2 }
  0x4d   : > { %p1565_p10 = por %p1564_p8, %p1563_p6 }
  0x4e   : > { %p1559_p5 = pneg %p1558_p4 }
  0x50   : > { %p1566_p12 = pnand %p1565_p10, %p1559_p5 }
  0x52   : > { %1569 = shalt.err (!%p1566_p12)
}
  0x53   : > { %1315 = dma.hbm_to_vmem [thread:$0]  (!%p1848_p13), %s2467_s2, 16, %s1852_s8, [#allocation6]  }
  0x54   : > { %s29_s11 = sadd.s32 1, %s1718_s20  ;;  %s32_s15 = sadd.s32 1, %s1722_s21 }
  0x55   : > { %p30_p2 = scmp.ge.s32.totalorder %s29_s11, 2  ;;  %s39_s6 = sadd.s32 1, %s1706_s17 }
  0x56   : > { %p46_p1 = scmp.ne.s32.totalorder %s1706_s17, %s1702_s16  ;;  %p47_p3 = scmp.eq.s32.totalorder %s1726_s22, 0 }
  0x57   : > { %s2493_s11 = smov (%p30_p2, %s29_s11), 0  ;;  %s2495_s15 = smov (!%p30_p2, %s32_s15), %s1722_s21 }
  0x58   : > { %2468 = sst [smem:[#allocation15_spill]] %s2493_s11  ;;  %p1914_p7 = por %p47_p3, %p46_p1 }
  0x59   : > { %s105_s24 = ssub.s32 %s1718_s20, %s2493_s11  ;;  %p34_p13 = scmp.ge.s32.totalorder %s2495_s15, 2 }
  0x5a   : > { %p1326_p9 = scmp.lt.s32.totalorder %s1726_s22, 4  ;;  %s170_s8 = sand.u32 1, %s1706_s17  }
  0x5b   : > { %s1295_s4 = smul.u32 3456, %s1722_s21  ;;  %s2497_s15 = smov (%p34_p13, %s2495_s15), 0 }
  0x5c   : > { %s1294_s7 = smul.u32 216, %s170_s8  ;;  %s36_s5 = ssub.s32 %s1722_s21, %s2497_s15 }
  0x5d   : > { %s1930_s29 = scalar_lea.hbm %s2440_s0, %s1295_s4  ;;  %p37_p11 = scmp.eq.s32.totalorder %s36_s5, 0 }
  0x5e   : > { %s106_s9 = sor.u32 %s105_s24, %s36_s5  ;;  %s2470_s1 = sadd.s32 1, %s1694_s14 }
  0x5f   : > { %p107_p0 = scmp.eq.s32.totalorder %s106_s9, 0  ;;  %s174_s11 = scalar_lea.vmem [#allocation2], %s1294_s7 }
  0x60   : > { %s1933_s10 = scalar_select %p37_p11, %s1706_s17, %s39_s6  }
  0x61   : > { %s1938_s2 = scalar_select %p107_p0, %s1694_s14, %s2470_s1  }
  0x62   : > { %s181_s20 = sshll.u32 %s174_s11, 4  ;;  %p1944_p4 = pnand %p1326_p9, %p1914_p7  ;;  %s1948_s20 = int_to_ptr.vmem [resolvable:$true] %s181_s20 }
  0x63   : > { %s1950_s24 = scalar_lea.sflag [#allocation3], %s170_s8  ;;  %s1570_s9 = scalar_lea.hbm %s1930_s29, 3456 }
  0x64   : > { %p1571_p5 = scmp.ne.s32.totalorder %s1930_s29, %s1570_s9  ;;  %p1572_p6 = pneg %p1944_p4 }
  0x65   : > { %s1575_s6 = scalar_lea.hbm %s2440_s0, 6912  ;;  %p1576_p12 = scmp.lt.u32.totalorder %s1930_s29, %s2440_s0 }
  0x66   : > { %p1573_p8 = pnand %p1572_p6, %p1571_p5  ;;  %p1577_p2 = scmp.lt.u32.totalorder %s1575_s6, %s1570_s9 }
  0x67   : > { %p1579_p3 = scmp.lt.u32.totalorder %s1570_s9, %s1930_s29 }
  0x68   : > { %p1574_p10 = pneg %p1573_p8  ;;  %p1578_p1 = por %p1577_p2, %p1576_p12 }
  0x6a   : > { %p1580_p7 = por %p1579_p3, %p1578_p1 }
  0x6c   : > { %p1581_p13 = pnand %p1580_p7, %p1574_p10 }
  0x6e   : > { %1584 = shalt.err (!%p1581_p13)
}
  0x6f   : > { %s1585_s8 = scalar_lea.vmem %s1948_s20, 3456  ;;  %s1732_s7 = smov [#allocation2]  }
  0x70   : > { %p1586_p9 = scmp.ne.s32.totalorder %s1948_s20, %s1585_s8  ;;  %s1590_s5 = sshll.u32 %s1732_s7, 4  ;;  %s1591_s5 = int_to_ptr.vmem [resolvable:$false] %s1590_s5 }
  0x71   : > { %s1592_s12 = scalar_lea.vmem %s1591_s5, 6912  ;;  %p1593_p5 = scmp.lt.s32.totalorder %s1948_s20, %s1591_s5 }
  0x72   : > { %p1588_p11 = pnand %p1586_p9, %p1572_p6  ;;  %p1594_p8 = scmp.lt.s32.totalorder %s1592_s12, %s1585_s8 }
  0x74   : > { %p1589_p0 = pneg %p1588_p11  ;;  %p1595_p12 = por %p1594_p8, %p1593_p5 }
  0x76   : > { %p1596_p2 = pnand %p1595_p12, %p1589_p0 }
  0x78   : > { %1599 = shalt.err (!%p1596_p2)
}
  0x79   : > { %s2472_s9 = smov 4   ;;  %s2473_s1 = smov 64  }
  0x7a   : > { %1319 = dma.hbm_to_vmem [thread:$0]  (!%p1944_p4), %s1930_s29, 3456, %s1948_s20, %s1950_s24, %s2473_s1, %s2473_s1, %s2472_s9  }
  0x7b   : > { %p2474_p6 = scmp.ne.s32.totalorder %s2464_s30, 0 }
  0x7c   : > { %s195_s11 = sand.u32 (!%p2474_p6), 1, %s1702_s16   ;;  %p2475_p10 = scmp.ne.s32.totalorder (!%p2474_p6), %s2460_s27, 0 }
  0x7d   : > { %193 = sbr.rel (%p2474_p6) target bundleno = 699 (0x2bb), region = 32  ;;  %s196_s23 = scalar_lea.sflag (!%p2474_p6), [#allocation3], %s195_s11 }
  0x7e   : > { %s1296_s6 = smul.u32 (!%p2474_p6), 216, %s195_s11 }
  0x80   : > { %s199_s4 = scalar_lea.vmem (!%p2474_p6), [#allocation2], %s1296_s6 }
  0x84   : > { %1673 = dma.done.wait (%p2475_p10), %s196_s23, 3456  }
  0x85   : > { %1675 = vsyncadd (%p2475_p10), %s196_s23, 4294963840  ;;  %p2476_p1 = scmp.ne.s32.totalorder %s2459_s25, 0 }
  0x87   : > { %1677 = dma.done.wait (%p2476_p1), [#allocation6], 336  }
  0x88   : > { %1679 = vsyncadd (%p2476_p1), [#allocation6], 4294966960  ;;  %s1235_s20 = smul.u32 96, %s1710_s18  ;;  %vm487_vm0 = vcmask 1046528   ;;  %vm346_vm1 = vsmask.f32 7424 }
  0x89   : > { %s1733_s25 = smov 8   ;;  %s1734_s27 = smov 4   ;;  %vm538_vm2 = vcmask 31744   ;;  %vm699_vm3 = vcmask 1041408   ;;  %vm559_vm4 = vcmask 64512   ;;  %vm621_vm5 = vcmask 97280  }
  0x8a   : > { %s1993_s30 = scalar_lea.vmem %s199_s4, %s1235_s20 [#allocation2]  ;;  %s1735_s29 = smov 12   ;;  %vm638_vm6 = vcmask 195584   ;;  %vm682_vm7 = vcmask 293888   ;;  %vm1024_vm14 = vcmask 27648  }
  0x8b   : > { %v1996_v0 = vld [vmem:[%s1993_s30 + $0x3c] sm:$0xff]   ;;  %v1428_v1 = vld [vmem:[%s1993_s30 + $0x44] ss:$0 sps:$4 sm:$0x11]   ;;  %v2000_v2 = vld [vmem:[%s1993_s30 + $0xc] sm:$0xff]   ;;  %s1736_s26 = smov 24  }
  0x8c   : > { %v503_v3 = vrot.slane %v1996_v0, 1  ;;  %v504_v4 = vrot.slane %v1428_v1, 1  ;;  %v1430_v5 = vld [vmem:[%s1993_s30 + $0x14] ss:$0 sps:$4 sm:$0x11]   ;;  %v2005_v6 = vld [vmem:[%s1993_s30 + $0x48] sm:$0xff]  }
  0x8d   : > { %v491_v7 = vrot.slane %v2000_v2, 1  ;;  %v2009_v8 = vld [vmem:[%s1993_s30 + $0x18] sm:$0xff]   ;;  %v492_v10 = vrot.slane %v1430_v5, 1  ;;  %v1432_v11 = vld [vmem:[%s1993_s30 + $0x50] ss:$0 sps:$4 sm:$0x11]  }
  0x8e   : > { %v505_v9 = vsel %vm487_vm0, %v503_v3, %v504_v4  ;;  %v506_v12 = vrot.slane %v2005_v6, 1  ;;  %v494_v13 = vrot.slane %v2009_v8, 1  ;;  %v507_v15 = vrot.slane %v1432_v11, 1  ;;  %v1434_v16 = vld [vmem:[%s1993_s30 + $0x20] ss:$0 sps:$4 sm:$0x11]  }
  0x8f   : > { %528 = vrot.lane.b32.xlu1 %v505_v9, %s1733_s25  ;;  %v493_v14 = vsel %vm487_vm0, %v491_v7, %v492_v10  ;;  %v372_v17 = vshrl.u32 %v2009_v8, 16  ;;  %v374_v18 = vshll.u32 %v2009_v8, 16  ;;  %v360_v19 = vshrl.u32 %v2000_v2, 16  ;;  %v2025_v25 = vld [vmem:[%s1993_s30 + $0x54] sm:$0xff]   ;;  %v2040_v47 = vld [vmem:[%s1993_s30 + $0x24] sm:$0xff]   ;;  %v2056_v63 = vld [vmem:[%s1993_s30 + $0x6c] sm:$0xff]  }
  0x90   : > { %520 = vrot.lane.b32.xlu0 %v493_v14, %s1733_s25  ;;  %v362_v20 = vshll.u32 %v2000_v2, 16  ;;  %v508_v21 = vsel %vm487_vm0, %v506_v12, %v507_v15  ;;  %v495_v22 = vrot.slane %v1434_v16, 1  ;;  %v379_v23 = vshll.u32 %v1434_v16, 16  ;;  %v1436_v34 = vld [vmem:[%s1993_s30 + $0x5c] ss:$0 sps:$4 sm:$0x11]  }
  0x91   : > { %v367_v24 = vshll.u32 %v1430_v5, 16  ;;  %v376_v26 = vrot.slane %v374_v18, 1  ;;  %v420_v28 = vshrl.u32 %v2005_v6, 16  ;;  %v422_v29 = vshll.u32 %v2005_v6, 16  ;;  %v2044_v49 = vld [vmem:[%s1993_s30 + $0x60] sm:$0xff]   ;;  %v2053_v58 = vld [vmem:[%s1993_s30 + $0x30] sm:$0xff]  }
  0x92   : > { %v364_v27 = vrot.slane %v362_v20, 1  ;;  %v496_v30 = vsel %vm487_vm0, %v494_v13, %v495_v22  ;;  %v381_v31 = vrot.slane %v379_v23, 1  ;;  %v427_v33 = vshll.u32 %v1432_v11, 16  ;;  %v1438_v48 = vld [vmem:[%s1993_s30 + $0x2c] ss:$0 sps:$4 sm:$0x11]  }
  0x93   : > { %530 = vrot.lane.b32.xlu1 %v508_v21, %s1733_s25  ;;  %v369_v32 = vrot.slane %v367_v24, 1  ;;  %v377_v35 = vor.u32 %v376_v26, %v372_v17  ;;  %v424_v37 = vrot.slane %v422_v29, 1  ;;  %v408_v38 = vshrl.u32 %v1996_v0, 16  ;;  %v1440_v7 = vld [vmem:[%s1993_s30 + $0x68] ss:$0 sps:$4 sm:$0x11]  }
  0x94   : > { %522 = vrot.lane.b32.xlu0 %v496_v30, %s1733_s25  ;;  %v365_v36 = vor.u32 %v364_v27, %v360_v19  ;;  %v429_v39 = vrot.slane %v427_v33, 1  ;;  %v410_v40 = vshll.u32 %v1996_v0, 16  ;;  %v415_v41 = vshll.u32 %v1428_v1, 16  ;;  %v1442_v15 = vld [vmem:[%s1993_s30 + $0x38] ss:$0 sps:$4 sm:$0x11]  }
  0x95   : > { %v432_v42 = vshrl.u32 %v2025_v25, 16  ;;  %v382_v43 = vsel %vm346_vm1, %v377_v35, %v381_v31  ;;  %v425_v45 = vor.u32 %v424_v37, %v420_v28  ;;  %v434_v46 = vshll.u32 %v2025_v25, 16  ;;  %v1444_v29 = vld [vmem:[%s1993_s30 + $0x74] ss:$0 sps:$4 sm:$0x11]   ;;  %s227_s24 = sand.u32 1, %s1690_s13  }
  0x96   : > { %v370_v44 = vsel %vm346_vm1, %v365_v36, %v369_v32  ;;  %v412_v50 = vrot.slane %v410_v40, 1  ;;  %v417_v51 = vrot.slane %v415_v41, 1  ;;  %v439_v52 = vshll.u32 %v1436_v34, 16  ;;  %s2293_s8 = sshll.u32 %s227_s24, 6  ;;  %s1252_s5 = sshll.u32 %s1710_s18, 4 }
  0x97   : > { %471 = vrot.lane.b32.xlu1 %v382_v43, %s1734_s27  ;;  %v509_v53 = vrot.slane %v2025_v25, 1  ;;  %v430_v54 = vsel %vm346_vm1, %v425_v45, %v429_v39  ;;  %v436_v55 = vrot.slane %v434_v46, 1  ;;  %v384_v56 = vshrl.u32 %v2040_v47, 16  ;;  %v1446_v39 = vld [vmem:[%s1993_s30 + $0x8] ss:$0 sps:$4 sm:$0x11]  }
  0x98   : > { %469 = vrot.lane.b32.xlu0 %v370_v44, %s1734_s27  ;;  %v386_v57 = vshll.u32 %v2040_v47, 16  ;;  %v413_v59 = vor.u32 %v412_v50, %v408_v38  ;;  %v441_v60 = vrot.slane %v439_v52, 1  ;;  %v391_v61 = vshll.u32 %v1438_v48, 16  ;;  %s2306_s7 = scalar_lea.vmem [#allocation8], %s2293_s8  ;;  %s1231_s12 = sshll.u32 %s1714_s19, 5 }
  0x99   : > { %v510_v62 = vrot.slane %v1436_v34, 1  ;;  %v437_v1 = vor.u32 %v436_v55, %v432_v42  ;;  %v497_v4 = vrot.slane %v2040_v47, 1  ;;  %v498_v5 = vrot.slane %v1438_v48, 1  ;;  %v2078_v34 = vld [vmem:[%s1993_s30] sm:$0xff]   ;;  %s1055_s9 = sadd.s32 %s1252_s5, %s1231_s12  ;;  %s1058_s1 = sshll.u32 %s2306_s7, 4  ;;  %s2367_s1 = int_to_ptr.vmem [resolvable:$true] %s1058_s1 }
  0x9a   : > { %v388_v3 = vrot.slane %v386_v57, 1  ;;  %v418_v9 = vsel %vm346_vm1, %v413_v59, %v417_v51  ;;  %v393_v10 = vrot.slane %v391_v61, 1  ;;  %v444_v11 = vshrl.u32 %v2044_v49, 16  ;;  %s1232_s11 = sshll.u32 %s1055_s9, 6  ;;  %s2378_s23 = scalar_lea.sflag [#allocation4], %s227_s24 }
  0x9b   : > { %479 = vrot.lane.b32.xlu1 %v430_v54, %s1734_s27  ;;  %v442_v12 = vsel %vm346_vm1, %v437_v1, %v441_v60  ;;  %v446_v14 = vshll.u32 %v2044_v49, 16  ;;  %v451_v16 = vshll.u32 %v1440_v7, 16  ;;  %v396_v17 = vshrl.u32 %v2053_v58, 16  ;;  %s2372_s6 = scalar_lea.hbm %s2443_s3, %s1232_s11  ;;  %s1600_s4 = scalar_lea.vmem %s2367_s1, 1024 }
  0x9c   : > { %477 = vrot.lane.b32.xlu0 %v418_v9, %s1734_s27  ;;  %v389_v13 = vor.u32 %v388_v3, %v384_v56  ;;  %v398_v18 = vshll.u32 %v2053_v58, 16  ;;  %v403_v21 = vshll.u32 %v1442_v15, 16  ;;  %v458_v23 = vshll.u32 %v2056_v63, 16  ;;  %v1447_v3 = vld [vmem:[#allocation5] sm:$0xff]   ;;  %p1601_p4 = scmp.ne.s32.totalorder %s2367_s1, %s1600_s4  ;;  %p2477_p3 = scmp.ne.s32.totalorder %s2461_s28, 0 }
  0x9d   : > { %v448_v20 = vrot.slane %v446_v14, 1  ;;  %v511_v24 = vsel %vm487_vm0, %v509_v53, %v510_v62  ;;  %v499_v26 = vsel %vm487_vm0, %v497_v4, %v498_v5  ;;  %v453_v28 = vrot.slane %v451_v16, 1  ;;  %1264 = vmatprep.subr.bf16.mxu0 %v1447_v3  ;;  %1286 = vmatprep.subr.bf16.mxu1 %v1447_v3  ;;  %s1737_s20 = smov [#allocation8]  }
  0x9e   : > { %v394_v19 = vsel %vm346_vm1, %v389_v13, %v393_v10  ;;  %v400_v22 = vrot.slane %v398_v18, 1  ;;  %v405_v31 = vrot.slane %v403_v21, 1  ;;  %v456_v32 = vshrl.u32 %v2056_v63, 16  ;;  %1265 = vmatpush3.bf16.msra.mxu0 %v1447_v3  ;;  %1289 = vmatpush3.bf16.msra.mxu1 %v1447_v3  ;;  %p1602_p7 = pnand %p1601_p4, %p2477_p3  ;;  %s1604_s30 = sshll.u32 %s1737_s20, 4  ;;  %s1605_s30 = int_to_ptr.vmem [resolvable:$false] %s1604_s30 }
  0x9f   : > { %481 = vrot.lane.b32.xlu1 %v442_v12, %s1734_s27  ;;  %v449_v27 = vor.u32 %v448_v20, %v444_v11  ;;  %v460_v33 = vrot.slane %v458_v23, 1  ;;  %v463_v35 = vshll.u32 %v1444_v29, 16  ;;  %v500_v36 = vrot.slane %v2053_v58, 1  ;;  %v1449_v11 = vld [vmem:[#allocation5 + $0x10] ss:$0 sps:$4 sm:$0x33]   ;;  %p1607_p9 = scmp.lt.s32.totalorder %s2367_s1, %s1605_s30 }
  0xa0   : > { %473 = vrot.lane.b32.xlu0 %v394_v19, %s1734_s27  ;;  %v401_v30 = vor.u32 %v400_v22, %v396_v17  ;;  %v501_v37 = vrot.slane %v1442_v15, 1  ;;  %v350_v43 = vshll.u32 %v2078_v34, 16  ;;  %v515_v45 = vrot.slane %v2056_v63, 1  ;;  %p1603_p13 = pneg %p1602_p7 }
  0xa1   : > { %v454_v38 = vsel %vm346_vm1, %v449_v27, %v453_v28  ;;  %v461_v41 = vor.u32 %v460_v33, %v456_v32  ;;  %v465_v42 = vrot.slane %v463_v35, 1  ;;  %v516_v46 = vrot.slane %v1444_v29, 1 }
  0xa2   : > { %v406_v40 = vsel %vm346_vm1, %v401_v30, %v405_v31  ;;  %v502_v44 = vsel %vm487_vm0, %v500_v36, %v501_v37  ;;  %v512_v48 = vrot.slane %v2044_v49, 1  ;;  %v513_v50 = vrot.slane %v1440_v7, 1  ;;  %v1448_v7 = vld [vmem:[#allocation5 + $0x8] sm:$0xff]  }
  0xa3   : > { %532 = vrot.lane.b32.xlu1 %v511_v24, %s1733_s25  ;;  %v466_v51 = vsel %vm346_vm1, %v461_v41, %v465_v42  ;;  %v348_v52 = vshrl.u32 %v2078_v34, 16  ;;  %v352_v53 = vrot.slane %v350_v43, 1  ;;  %v355_v54 = vshll.u32 %v1446_v39, 16  ;;  %1266 = vmatprep.subr.bf16.mxu0 %v1448_v7 }
  0xa4   : > { %524 = vrot.lane.b32.xlu0 %v499_v26, %s1733_s25  ;;  %v517_v55 = vsel %vm487_vm0, %v515_v45, %v516_v46  ;;  %v488_v56 = vrot.slane %v2078_v34, 1  ;;  %v489_v57 = vrot.slane %v1446_v39, 1  ;;  %v514_v59 = vsel %vm487_vm0, %v512_v48, %v513_v50  ;;  %1287 = vmatprep.subr.bf16.mxu1 %v1448_v7 }
  0xa5   : > { %v353_v60 = vor.u32 %v352_v53, %v348_v52  ;;  %v357_v61 = vrot.slane %v355_v54, 1  ;;  %1267 = vmatpush3.bf16.msra.mxu0 %v1448_v7  ;;  %1290 = vmatpush3.bf16.msra.mxu1 %v1448_v7  ;;  %v701_v13 = vsel %vm699_vm3, %v1449_v11, 0 }
  0xa6   : > { %v490_v62 = vsel %vm487_vm0, %v488_v56, %v489_v57  ;;  %1292 = vmatprep.subr.msk.bf16.mxu0 %vm699_vm3, %v1449_v11  ;;  %1293 = vmatprep.subr.msk.bf16.mxu1 %vm699_vm3, %v1449_v11 }
  0xa7   : > { %483 = vrot.lane.b32.xlu1 %v454_v38, %s1734_s27  ;;  %v358_v1 = vsel %vm346_vm1, %v353_v60, %v357_v61 }
  0xa8   : > { %475 = vrot.lane.b32.xlu0 %v406_v40, %s1734_s27 }
  0xa9   : > { %1269 = vmatpush3.bf16.msra.mxu0 %v701_v13  ;;  %1291 = vmatpush3.bf16.msra.mxu1 %v701_v13 }
  0xab   : > { %526 = vrot.lane.b32.xlu1 %v502_v44, %s1733_s25 }
  0xac   : > { %485 = vrot.lane.b32.xlu0 %v466_v51, %s1734_s27 }
  0xaf   : > { %536 = vrot.lane.b32.xlu1 %v517_v55, %s1733_s25 }
  0xb0   : > { %534 = vrot.lane.b32.xlu0 %v514_v59, %s1733_s25 }
  0xb3   : > { %518 = vrot.lane.b32.xlu1 %v490_v62, %s1733_s25  ;;  %s1606_s25 = scalar_lea.vmem %s1605_s30, 2048 }
  0xb4   : > { %467 = vrot.lane.b32.xlu0 %v358_v1, %s1734_s27  ;;  %p1608_p11 = scmp.lt.s32.totalorder %s1606_s25, %s1600_s4 }
  0xb6   : > { %p1609_p0 = por %p1608_p11, %p1607_p9 }
  0xb8   : > { %p1610_p5 = pnand %p1609_p0, %p1603_p13 }
 0x101   : > { %v529_v4 = vpop.permute.xlu1 %528 }
 0x102   : > { %v521_v5 = vpop.permute.xlu0 %520 }
 0x105   : > { %v531_v9 = vpop.permute.xlu1 %530 }
 0x106   : > { %v523_v10 = vpop.permute.xlu0 %522 }
 0x109   : > { %v472_v12 = vpop.permute.xlu1 %471 }
 0x10a   : > { %v470_v14 = vpop.permute.xlu0 %469  ;;  %v544_v17 = vsel %vm538_vm2, %v2009_v8, %v472_v12 }
 0x10b   : > { %v542_v15 = vsel %vm538_vm2, %v2000_v2, %v470_v14  ;;  %v2120_v2 = vsel %vm559_vm4, %v544_v17, %v523_v10  ;;  %v2204_v17 = vld [vmem:[#allocation7] ss:$0 sm:$0xff] }
 0x10c   : > { %v2108_v16 = vsel %vm559_vm4, %v542_v15, %v521_v5 }
 0x10d   : > { %588 = vrot.lane.b32.xlu0 %v2108_v16, %s1735_s29  ;;  %v480_v18 = vpop.permute.xlu1 %479 }
 0x10e   : > { %v478_v19 = vpop.permute.xlu0 %477  ;;  %v552_v22 = vsel %vm538_vm2, %v2005_v6, %v480_v18 }
 0x10f   : > { %v550_v20 = vsel %vm538_vm2, %v1996_v0, %v478_v19  ;;  %v2129_v24 = vsel %vm559_vm4, %v552_v22, %v531_v9 }
 0x110   : > { %v2117_v21 = vsel %vm559_vm4, %v550_v20, %v529_v4 }
 0x111   : > { %596 = vrot.lane.b32.xlu1 %v2117_v21, %s1735_s29  ;;  %590 = vrot.lane.b32.xlu0 %v2120_v2, %s1735_s29  ;;  %v482_v8 = vpop.permute.xlu1 %481 }
 0x112   : > { %v474_v23 = vpop.permute.xlu0 %473  ;;  %v554_v28 = vsel %vm538_vm2, %v2025_v25, %v482_v8 }
 0x113   : > { %v546_v6 = vsel %vm538_vm2, %v2040_v47, %v474_v23 }
 0x115   : > { %598 = vrot.lane.b32.xlu1 %v2129_v24, %s1735_s29  ;;  %605 = vrot.lane.b32.xlu0 %v2120_v2, %s1736_s26  ;;  %v533_v0 = vpop.permute.xlu1 %532 }
 0x116   : > { %v525_v26 = vpop.permute.xlu0 %524  ;;  %v2147_v31 = vsel %vm559_vm4, %v554_v28, %v533_v0 }
 0x117   : > { %v2138_v27 = vsel %vm559_vm4, %v546_v6, %v525_v26 }
 0x119   : > { %613 = vrot.lane.b32.xlu1 %v2129_v24, %s1736_s26  ;;  %607 = vrot.lane.b32.xlu0 %v2138_v27, %s1736_s26  ;;  %v484_v29 = vpop.permute.xlu1 %483 }
 0x11a   : > { %v476_v30 = vpop.permute.xlu0 %475  ;;  %v556_v36 = vsel %vm538_vm2, %v2044_v49, %v484_v29 }
 0x11b   : > { %v548_v47 = vsel %vm538_vm2, %v2053_v58, %v476_v30 }
 0x11d   : > { %615 = vrot.lane.b32.xlu1 %v2147_v31, %s1736_s26  ;;  %592 = vrot.lane.b32.xlu0 %v2138_v27, %s1735_s29  ;;  %v527_v25 = vpop.permute.xlu1 %526 }
 0x11e   : > { %v486_v32 = vpop.permute.xlu0 %485  ;;  %v569_v33 = vsel %vm559_vm4, %v548_v47, %v527_v25 }
 0x11f   : > { %v558_v49 = vsel %vm538_vm2, %v2056_v63, %v486_v32 }
 0x121   : > { %600 = vrot.lane.b32.xlu1 %v2147_v31, %s1735_s29  ;;  %594 = vrot.lane.b32.xlu0 %v569_v33, %s1735_s29  ;;  %v537_v35 = vpop.permute.xlu1 %536 }
 0x122   : > { %v535_v58 = vpop.permute.xlu0 %534  ;;  %v579_v42 = vsel %vm559_vm4, %v558_v49, %v537_v35 }
 0x123   : > { %v577_v37 = vsel %vm559_vm4, %v556_v36, %v535_v58 }
 0x125   : > { %602 = vrot.lane.b32.xlu1 %v577_v37, %s1735_s29  ;;  %609 = vrot.lane.b32.xlu0 %v569_v33, %s1736_s26  ;;  %v519_v38 = vpop.permute.xlu1 %518 }
 0x126   : > { %v468_v39 = vpop.permute.xlu0 %467 }
 0x127   : > { %v540_v40 = vsel %vm538_vm2, %v2078_v34, %v468_v39 }
 0x128   : > { %v561_v41 = vsel %vm559_vm4, %v540_v40, %v519_v38 }
 0x129   : > { %617 = vrot.lane.b32.xlu1 %v577_v37, %s1736_s26  ;;  %611 = vrot.lane.b32.xlu0 %v2117_v21, %s1736_s26 }
 0x12d   : > { %619 = vrot.lane.b32.xlu1 %v579_v42, %s1736_s26 }
 0x17f   : > { %v589_v43 = vpop.permute.xlu0 %588 }
 0x180   : > { %v623_v34 = vsel %vm621_vm5, %v561_v41, %v589_v43 }
 0x183   : > { %v597_v44 = vpop.permute.xlu1 %596  ;;  %v591_v45 = vpop.permute.xlu0 %590 }
 0x184   : > { %v631_v63 = vsel %vm621_vm5, %v569_v33, %v597_v44  ;;  %v625_v51 = vsel %vm621_vm5, %v2108_v16, %v591_v45 }
 0x187   : > { %v599_v46 = vpop.permute.xlu1 %598  ;;  %v606_v48 = vpop.permute.xlu0 %605 }
 0x188   : > { %v640_v50 = vsel %vm638_vm6, %v623_v34, %v606_v48  ;;  %v633_v56 = vsel %vm621_vm5, %v2117_v21, %v599_v46 }
 0x189   : > { %1270 = vmatprep.mubr.msk.bf16.mxu0 %vm682_vm7, %v640_v50 }
 0x18b   : > { %v614_v52 = vpop.permute.xlu1 %613  ;;  %v608_v53 = vpop.permute.xlu0 %607 }
 0x18c   : > { %v642_v54 = vsel %vm638_vm6, %v625_v51, %v608_v53  ;;  %v648_v55 = vsel %vm638_vm6, %v631_v63, %v614_v52 }
 0x18d   : > { %1271 = vmatmul.mubr.msk.bf16.vlgmr.msra.gmra.mrb[0].mxu0 %vm682_vm7, %v642_v54  ;;  %1278 = vmatprep.mubr.msk.bf16.mxu1 %vm682_vm7, %v648_v55 }
 0x18f   : > { %v616_v57 = vpop.permute.xlu1 %615  ;;  %v593_v59 = vpop.permute.xlu0 %592 }
 0x190   : > { %v650_v60 = vsel %vm638_vm6, %v633_v56, %v616_v57  ;;  %v627_v1 = vsel %vm621_vm5, %v2120_v2, %v593_v59 }
 0x191   : > { %1279 = vmatmul.mubr.msk.bf16.vlgmr.msra.gmra.mrb[0].mxu1 %vm682_vm7, %v650_v60 }
 0x193   : > { %v601_v61 = vpop.permute.xlu1 %600  ;;  %v595_v62 = vpop.permute.xlu0 %594 }
 0x194   : > { %v635_v7 = vsel %vm621_vm5, %v2129_v24, %v601_v61  ;;  %v629_v9 = vsel %vm621_vm5, %v2138_v27, %v595_v62 }
 0x197   : > { %v603_v3 = vpop.permute.xlu1 %602  ;;  %v610_v4 = vpop.permute.xlu0 %609 }
 0x198   : > { %v644_v5 = vsel %vm638_vm6, %v627_v1, %v610_v4  ;;  %v637_v14 = vsel %vm621_vm5, %v2147_v31, %v603_v3 }
 0x199   : > { %1274 = vmatprep.mubr.msk.bf16.mxu0 %vm682_vm7, %v644_v5 }
 0x19b   : > { %v618_v10 = vpop.permute.xlu1 %617  ;;  %v612_v11 = vpop.permute.xlu0 %611 }
 0x19c   : > { %v652_v12 = vsel %vm638_vm6, %v635_v7, %v618_v10  ;;  %v646_v13 = vsel %vm638_vm6, %v629_v9, %v612_v11 }
 0x19d   : > { %1275 = vmatmul.mubr.msk.bf16.gmra.mrb[4].mxu0 %vm682_vm7, %v646_v13  ;;  %1282 = vmatprep.mubr.msk.bf16.mxu1 %vm682_vm7, %v652_v12 }
 0x19f   : > { %v620_v15 = vpop.permute.xlu1 %619 }
 0x1a0   : > { %v654_v16 = vsel %vm638_vm6, %v637_v14, %v620_v15 }
 0x1a1   : > { %1283 = vmatmul.mubr.msk.bf16.gmra.mrb[4].mxu1 %vm682_vm7, %v654_v16 }
 0x260   : > { %v1272_v18 = vpop.f32.mrb[0].mxu0 }
 0x261   : > { %v2207_v19 = vadd.f32 %v1272_v18, %v2204_v17  ;;  %v737_v20 = vpop.f32.mrb[1].mxu0 }
 0x262   : > { %v2210_v21 = vadd.f32 %v2204_v17, %v737_v20  ;;  %v1273_v2 = vpop.f32.mrb[2].mxu0 }
 0x263   : > { %v802_v22 = vand.u32 2147483647, %v2207_v19  ;;  %v2214_v8 = vadd.f32 %v1273_v2, %v2204_v17  ;;  %v740_v23 = vpop.f32.mrb[3].mxu0  ;;  %vm866_vm8 = vcmp.ge.f32.partialorder %v2207_v19, 0.0 }
 0x264   : > { %v800_v24 = vand.u32 2147483647, %v2210_v21  ;;  %v2218_v0 = vadd.f32 %v2204_v17, %v740_v23  ;;  %v1280_v6 = vpop.f32.mrb[0].mxu1  ;;  %vm864_vm9 = vcmp.ge.f32.partialorder %v2210_v21, 0.0 }
 0x265   : > { %v818_v26 = vsub.f32 0.0, %v802_v22  ;;  %v803_v27 = vand.u32 2147483647, %v2214_v8  ;;  %v2222_v28 = vadd.f32 %v1280_v6, %v2204_v17  ;;  %v769_v29 = vpop.f32.mrb[1].mxu1  ;;  %vm867_vm10 = vcmp.ge.f32.partialorder %v2214_v8, 0.0 }
 0x266   : > { %v816_v30 = vsub.f32 0.0, %v800_v24  ;;  %v801_v31 = vand.u32 2147483647, %v2218_v0  ;;  %v2226_v47 = vadd.f32 %v2204_v17, %v769_v29  ;;  %v1281_v25 = vpop.f32.mrb[2].mxu1  ;;  %vm865_vm11 = vcmp.ge.f32.partialorder %v2218_v0, 0.0 }
 0x267   : > { %v836_v32 = vmul.f32 1.442695, %v818_v26  ;;  %v819_v33 = vsub.f32 0.0, %v803_v27  ;;  %v810_v35 = vand.u32 2147483647, %v2222_v28  ;;  %v2231_v40 = vadd.f32 %v1281_v25, %v2204_v17  ;;  %v772_v41 = vpop.f32.mrb[3].mxu1 }
 0x268   : > { %v832_v36 = vmul.f32 1.442695, %v816_v30  ;;  %v817_v58 = vsub.f32 0.0, %v801_v31  ;;  %v808_v37 = vand.u32 2147483647, %v2226_v47  ;;  %v2234_v43 = vadd.f32 %v2204_v17, %v772_v41 }
 0x269   : > { %1450 = vpow2.f32 %v836_v32  ;;  %v838_v38 = vmul.f32 1.442695, %v819_v33  ;;  %v826_v39 = vsub.f32 0.0, %v810_v35  ;;  %v811_v45 = vand.u32 2147483647, %v2231_v40 }
 0x26a   : > { %1452 = vpow2.f32 %v832_v36  ;;  %v834_v49 = vmul.f32 1.442695, %v817_v58  ;;  %v824_v42 = vsub.f32 0.0, %v808_v37  ;;  %v809_v46 = vand.u32 2147483647, %v2234_v43 }
 0x26b   : > { %1454 = vpow2.f32 %v838_v38  ;;  %v852_v44 = vmul.f32 1.442695, %v826_v39  ;;  %v827_v48 = vsub.f32 0.0, %v811_v45  ;;  %vm874_vm12 = vcmp.ge.f32.partialorder %v2222_v28, 0.0 }
 0x26c   : > { %1456 = vpow2.f32 %v834_v49  ;;  %v848_v34 = vmul.f32 1.442695, %v824_v42  ;;  %v825_v50 = vsub.f32 0.0, %v809_v46  ;;  %vm872_vm13 = vcmp.ge.f32.partialorder %v2226_v47, 0.0 }
 0x26d   : > { %1458 = vpow2.f32 %v852_v44  ;;  %v854_v63 = vmul.f32 1.442695, %v827_v48  ;;  %vm875_vm15 = vcmp.ge.f32.partialorder %v2231_v40, 0.0  ;;  %vm873_vm0 = vcmp.ge.f32.partialorder %v2234_v43, 0.0 }
 0x26e   : > { %1460 = vpow2.f32 %v848_v34  ;;  %v850_v51 = vmul.f32 1.442695, %v825_v50 }
 0x26f   : > { %1462 = vpow2.f32 %v854_v63 }
 0x270   : > { %v1276_v52 = vpop.f32.mrb[4].mxu0  ;;  %1464 = vpow2.f32 %v850_v51 }
 0x271   : > { %v2239_v53 = vadd.f32 %v1276_v52, %v2204_v17  ;;  %v753_v54 = vpop.f32.mrb[5].mxu0 }
 0x272   : > { %v2242_v55 = vadd.f32 %v2204_v17, %v753_v54  ;;  %v1277_v56 = vpop.f32.mrb[6].mxu0 }
 0x273   : > { %v1451_v57 = vpop.eup %1450  ;;  %v806_v59 = vand.u32 2147483647, %v2239_v53  ;;  %v2246_v60 = vadd.f32 %v1277_v56, %v2204_v17  ;;  %v756_v61 = vpop.f32.mrb[7].mxu0  ;;  %vm870_vm1 = vcmp.ge.f32.partialorder %v2239_v53, 0.0 }
 0x274   : > { %v1453_v62 = vpop.eup %1452  ;;  %v898_v1 = vadd.f32 1.0, %v1451_v57  ;;  %v804_v3 = vand.u32 2147483647, %v2242_v55  ;;  %v1284_v4 = vpop.f32.mrb[4].mxu1  ;;  %v2256_v27 = vadd.f32 %v2204_v17, %v756_v61  ;;  %v882_v58 = vsel %vm866_vm8, 1.0, %v1451_v57 }
 0x275   : > { %v1455_v5 = vpop.eup %1454  ;;  %v896_v7 = vadd.f32 1.0, %v1453_v62  ;;  %v822_v9 = vsub.f32 0.0, %v806_v59  ;;  %v807_v10 = vand.u32 2147483647, %v2246_v60  ;;  %v785_v11 = vpop.f32.mrb[5].mxu1  ;;  %v2259_v29 = vadd.f32 %v1284_v4, %v2204_v17 }
 0x276   : > { %v1457_v12 = vpop.eup %1456  ;;  %1466 = vrcp.f32 %v898_v1  ;;  %v899_v13 = vadd.f32 1.0, %v1455_v5  ;;  %v820_v14 = vsub.f32 0.0, %v804_v3  ;;  %v1285_v15 = vpop.f32.mrb[6].mxu1  ;;  %v2265_v31 = vadd.f32 %v2204_v17, %v785_v11 }
 0x277   : > { %v1459_v16 = vpop.eup %1458  ;;  %1468 = vrcp.f32 %v896_v7  ;;  %v897_v18 = vadd.f32 1.0, %v1457_v12  ;;  %v788_v20 = vpop.f32.mrb[7].mxu1  ;;  %v844_v23 = vmul.f32 1.442695, %v822_v9  ;;  %v823_v26 = vsub.f32 0.0, %v807_v10 }
 0x278   : > { %v1461_v2 = vpop.eup %1460  ;;  %1470 = vrcp.f32 %v899_v13  ;;  %v906_v22 = vadd.f32 1.0, %v1459_v16  ;;  %v840_v6 = vmul.f32 1.442695, %v820_v14  ;;  %v2268_v25 = vadd.f32 %v1285_v15, %v2204_v17 }
 0x279   : > { %1472 = vrcp.f32 %v897_v18  ;;  %v904_v24 = vadd.f32 1.0, %v1461_v2  ;;  %v2261_v30 = vpop.eup %1462  ;;  %v846_v35 = vmul.f32 1.442695, %v823_v26  ;;  %v805_v36 = vand.u32 2147483647, %v2256_v27 }
 0x27a   : > { %1474 = vrcp.f32 %v906_v22  ;;  %v2270_v32 = vpop.eup %1464  ;;  %v907_v33 = vadd.f32 1.0, %v2261_v30  ;;  %v880_v37 = vsel %vm864_vm9, 1.0, %v1453_v62  ;;  %v883_v39 = vsel %vm867_vm10, 1.0, %v1455_v5 }
 0x27b   : > { %1476 = vrcp.f32 %v904_v24  ;;  %v905_v38 = vadd.f32 1.0, %v2270_v32  ;;  %v821_v41 = vsub.f32 0.0, %v805_v36  ;;  %v814_v49 = vand.u32 2147483647, %v2259_v29 }
 0x27c   : > { %1478 = vpow2.f32 %v844_v23  ;;  %v881_v42 = vsel %vm865_vm11, 1.0, %v1457_v12  ;;  %v812_v44 = vand.u32 2147483647, %v2265_v31  ;;  %v815_v45 = vand.u32 2147483647, %v2268_v25 }
 0x27d   : > { %1480 = vpow2.f32 %v840_v6  ;;  %v890_v46 = vsel %vm874_vm12, 1.0, %v1459_v16  ;;  %v842_v48 = vmul.f32 1.442695, %v821_v41  ;;  %v830_v50 = vsub.f32 0.0, %v814_v49 }
 0x27e   : > { %1482 = vrcp.f32 %v907_v33  ;;  %v828_v52 = vsub.f32 0.0, %v812_v44  ;;  %v831_v54 = vsub.f32 0.0, %v815_v45  ;;  %v2296_v56 = vadd.f32 %v2204_v17, %v788_v20 }
 0x27f   : > { %1484 = vrcp.f32 %v905_v38  ;;  %v888_v61 = vsel %vm872_vm13, 1.0, %v1461_v2  ;;  %v860_v62 = vmul.f32 1.442695, %v830_v50  ;;  %v889_v26 = vsel %vm873_vm0, 1.0, %v2270_v32 }
 0x280   : > { %v1467_v34 = vpop.eup %1466  ;;  %1486 = vpow2.f32 %v846_v35  ;;  %v856_v5 = vmul.f32 1.442695, %v828_v52  ;;  %v862_v7 = vmul.f32 1.442695, %v831_v54  ;;  %v813_v17 = vand.u32 2147483647, %v2296_v56 }
 0x281   : > { %v1469_v63 = vpop.eup %1468  ;;  %v917_v51 = vmul.f32 %v1467_v34, %v882_v58  ;;  %1488 = vpow2.f32 %v842_v48  ;;  %vm868_vm2 = vcmp.ge.f32.partialorder %v2242_v55, 0.0  ;;  %vm871_vm3 = vcmp.ge.f32.partialorder %v2246_v60, 0.0 }
 0x282   : > { %v1471_v57 = vpop.eup %1470  ;;  %v913_v59 = vmul.f32 %v1469_v63, %v880_v37  ;;  %1490 = vpow2.f32 %v860_v62  ;;  %vm869_vm4 = vcmp.ge.f32.partialorder %v2256_v27, 0.0  ;;  %vm878_vm5 = vcmp.ge.f32.partialorder %v2259_v29, 0.0 }
 0x283   : > { %v1473_v1 = vpop.eup %1472  ;;  %v946_v3 = vmul.f32 %v917_v51, %v2207_v19  ;;  %v919_v4 = vmul.f32 %v1471_v57, %v883_v39  ;;  %1492 = vpow2.f32 %v856_v5  ;;  %vm876_vm6 = vcmp.ge.f32.partialorder %v2265_v31, 0.0 }
 0x284   : > { %v1475_v9 = vpop.eup %1474  ;;  %v944_v10 = vmul.f32 %v913_v59, %v2210_v21  ;;  %v915_v11 = vmul.f32 %v1473_v1, %v881_v42  ;;  %1494 = vpow2.f32 %v862_v7  ;;  %vm879_vm7 = vcmp.ge.f32.partialorder %v2268_v25, 0.0 }
 0x285   : > { %v1477_v12 = vpop.eup %1476  ;;  %v1238_v13 = vpack.c.bf16 %v946_v3, %v946_v3  ;;  %v947_v14 = vmul.f32 %v919_v4, %v2214_v8  ;;  %v933_v15 = vmul.f32 %v1475_v9, %v890_v46  ;;  %v891_v8 = vsel %vm875_vm15, 1.0, %v2261_v30 }
 0x286   : > { %v1479_v16 = vpop.eup %1478  ;;  %v1236_v18 = vpack.c.bf16 %v944_v10, %v944_v10  ;;  %v945_v19 = vmul.f32 %v915_v11, %v2218_v0  ;;  %v929_v20 = vmul.f32 %v1477_v12, %v888_v61  ;;  %v829_v30 = vsub.f32 0.0, %v813_v17 }
 0x287   : > { %v1481_v2 = vpop.eup %1480  ;;  %1027 = vst.msk [vmem:[%s2306_s7 + $0x8] sm:$0xf] %vm1024_vm14, %v1238_v13  ;;  %v1239_v21 = vpack.c.bf16 %v947_v14, %v947_v14  ;;  %v954_v22 = vmul.f32 %v933_v15, %v2222_v28  ;;  %v902_v23 = vadd.f32 1.0, %v1479_v16  ;;  %v886_v51 = vsel %vm870_vm1, 1.0, %v1479_v16 }
 0x288   : > { %v1483_v0 = vpop.eup %1482  ;;  %1025 = vst.msk [vmem:[%s2306_s7] sm:$0xf] %vm1024_vm14, %v1236_v18  ;;  %v1237_v24 = vpack.c.bf16 %v945_v19, %v945_v19  ;;  %v952_v6 = vmul.f32 %v929_v20, %v2226_v47  ;;  %v900_v33 = vadd.f32 1.0, %v1481_v2  ;;  %v858_v39 = vmul.f32 1.442695, %v829_v30 }
 0x289   : > { %v1485_v35 = vpop.eup %1484  ;;  %1028 = vst.msk [vmem:[%s2306_s7 + $0xc] sm:$0xf] %vm1024_vm14, %v1239_v21  ;;  %v1246_v28 = vpack.c.bf16 %v954_v22, %v954_v22  ;;  %v935_v36 = vmul.f32 %v1483_v0, %v891_v8  ;;  %1496 = vrcp.f32 %v902_v23  ;;  %v884_v57 = vsel %vm868_vm2, 1.0, %v1481_v2 }
 0x28a   : > { %v1487_v58 = vpop.eup %1486  ;;  %1026 = vst.msk [vmem:[%s2306_s7 + $0x4] sm:$0xf] %vm1024_vm14, %v1237_v24  ;;  %v1244_v37 = vpack.c.bf16 %v952_v6, %v952_v6  ;;  %v931_v38 = vmul.f32 %v1485_v35, %v889_v26  ;;  %1498 = vrcp.f32 %v900_v33  ;;  %vm877_vm8 = vcmp.ge.f32.partialorder %v2296_v56, 0.0 }
 0x28b   : > { %1035 = vst.msk [vmem:[%s2306_s7 + $0x28] sm:$0xf] %vm1024_vm14, %v1246_v28  ;;  %v955_v47 = vmul.f32 %v935_v36, %v2231_v40  ;;  %v903_v32 = vadd.f32 1.0, %v1487_v58  ;;  %v1489_v41 = vpop.eup %1488  ;;  %v887_v3 = vsel %vm871_vm3, 1.0, %v1487_v58 }
 0x28c   : > { %1033 = vst.msk [vmem:[%s2306_s7 + $0x20] sm:$0xf] %vm1024_vm14, %v1244_v37  ;;  %v953_v49 = vmul.f32 %v931_v38, %v2234_v43  ;;  %v901_v44 = vadd.f32 1.0, %v1489_v41  ;;  %v1491_v45 = vpop.eup %1490  ;;  %v885_v11 = vsel %vm869_vm4, 1.0, %v1489_v41 }
 0x28d   : > { %v1247_v42 = vpack.c.bf16 %v955_v47, %v955_v47  ;;  %1500 = vrcp.f32 %v903_v32  ;;  %v1493_v46 = vpop.eup %1492  ;;  %v910_v48 = vadd.f32 1.0, %v1491_v45 }
 0x28e   : > { %v1245_v34 = vpack.c.bf16 %v953_v49, %v953_v49  ;;  %1502 = vpow2.f32 %v858_v39  ;;  %v1495_v40 = vpop.eup %1494  ;;  %v908_v50 = vadd.f32 1.0, %v1493_v46  ;;  %v892_v18 = vsel %vm876_vm6, 1.0, %v1493_v46 }
 0x28f   : > { %1036 = vst.msk [vmem:[%s2306_s7 + $0x2c] sm:$0xf] %vm1024_vm14, %v1247_v42  ;;  %1504 = vrcp.f32 %v901_v44  ;;  %v911_v63 = vadd.f32 1.0, %v1495_v40  ;;  %v895_v2 = vsel %vm879_vm7, 1.0, %v1495_v40 }
 0x290   : > { %1034 = vst.msk [vmem:[%s2306_s7 + $0x24] sm:$0xf] %vm1024_vm14, %v1245_v34  ;;  %1506 = vrcp.f32 %v910_v48 }
 0x291   : > { %1508 = vrcp.f32 %v908_v50 }
 0x292   : > { %1510 = vrcp.f32 %v911_v63 }
 0x293   : > { %v1497_v43 = vpop.eup %1496 }
 0x294   : > { %v1499_v52 = vpop.eup %1498  ;;  %v925_v54 = vmul.f32 %v1497_v43, %v886_v51 }
 0x295   : > { %v921_v59 = vmul.f32 %v1499_v52, %v884_v57 }
 0x296   : > { %v950_v61 = vmul.f32 %v925_v54, %v2239_v53 }
 0x297   : > { %v1501_v62 = vpop.eup %1500  ;;  %v948_v1 = vmul.f32 %v921_v59, %v2242_v55  ;;  %v894_v55 = vsel %vm878_vm5, 1.0, %v1491_v45 }
 0x298   : > { %v1503_v4 = vpop.eup %1502  ;;  %v1242_v5 = vpack.c.bf16 %v950_v61, %v950_v61  ;;  %v927_v7 = vmul.f32 %v1501_v62, %v887_v3 }
 0x299   : > { %v1505_v9 = vpop.eup %1504  ;;  %v1240_v10 = vpack.c.bf16 %v948_v1, %v948_v1  ;;  %v909_v17 = vadd.f32 1.0, %v1503_v4 }
 0x29a   : > { %1031 = vst.msk [vmem:[%s2306_s7 + $0x18] sm:$0xf] %vm1024_vm14, %v1242_v5  ;;  %v951_v53 = vmul.f32 %v927_v7, %v2246_v60  ;;  %v923_v12 = vmul.f32 %v1505_v9, %v885_v11  ;;  %v1507_v13 = vpop.eup %1506 }
 0x29b   : > { %1029 = vst.msk [vmem:[%s2306_s7 + $0x10] sm:$0xf] %vm1024_vm14, %v1240_v10  ;;  %1512 = vrcp.f32 %v909_v17  ;;  %v1509_v14 = vpop.eup %1508  ;;  %v941_v60 = vmul.f32 %v1507_v13, %v894_v55 }
 0x29c   : > { %v1243_v15 = vpack.c.bf16 %v951_v53, %v951_v53  ;;  %v949_v16 = vmul.f32 %v923_v12, %v2256_v27  ;;  %v1511_v19 = vpop.eup %1510  ;;  %v937_v20 = vmul.f32 %v1509_v14, %v892_v18 }
 0x29d   : > { %v958_v22 = vmul.f32 %v941_v60, %v2259_v29  ;;  %v943_v8 = vmul.f32 %v1511_v19, %v895_v2 }
 0x29e   : > { %1032 = vst.msk [vmem:[%s2306_s7 + $0x1c] sm:$0xf] %vm1024_vm14, %v1243_v15  ;;  %v1241_v21 = vpack.c.bf16 %v949_v16, %v949_v16  ;;  %v956_v23 = vmul.f32 %v937_v20, %v2265_v31  ;;  %v893_v31 = vsel %vm877_vm8, 1.0, %v1503_v4 }
 0x29f   : > { %v1250_v27 = vpack.c.bf16 %v958_v22, %v958_v22  ;;  %v959_v0 = vmul.f32 %v943_v8, %v2268_v25 }
 0x2a0   : > { %1030 = vst.msk [vmem:[%s2306_s7 + $0x14] sm:$0xf] %vm1024_vm14, %v1241_v21  ;;  %v1248_v24 = vpack.c.bf16 %v956_v23, %v956_v23 }
 0x2a1   : > { %1039 = vst.msk [vmem:[%s2306_s7 + $0x38] sm:$0xf] %vm1024_vm14, %v1250_v27  ;;  %v1251_v6 = vpack.c.bf16 %v959_v0, %v959_v0 }
 0x2a2   : > { %1037 = vst.msk [vmem:[%s2306_s7 + $0x30] sm:$0xf] %vm1024_vm14, %v1248_v24 }
 0x2a3   : > { %1040 = vst.msk [vmem:[%s2306_s7 + $0x3c] sm:$0xf] %vm1024_vm14, %v1251_v6 }
 0x2a5   : > { %v1513_v29 = vpop.eup %1512 }
 0x2a6   : > { %v939_v26 = vmul.f32 %v1513_v29, %v893_v31 }
 0x2a8   : > { %v957_v25 = vmul.f32 %v939_v26, %v2296_v56 }
 0x2aa   : > { %v1249_v33 = vpack.c.bf16 %v957_v25, %v957_v25 }
 0x2ac   : > { %1038 = vst.msk [vmem:[%s2306_s7 + $0x34] sm:$0xf] %vm1024_vm14, %v1249_v33 }
 0x2ad   : > { %1613 = shalt.err (!%p1610_p5)
}
 0x2ae   : > { %s1614_s29 = scalar_lea.hbm %s2372_s6, 1024  ;;  %s1618_s8 = scalar_lea.hbm %s2443_s3, 4096 }
 0x2af   : > { %p1615_p8 = scmp.ne.s32.totalorder %s2372_s6, %s1614_s29  ;;  %p1619_p6 = scmp.lt.u32.totalorder %s2372_s6, %s2443_s3 }
 0x2b0   : > { %p1620_p10 = scmp.lt.u32.totalorder %s1618_s8, %s1614_s29  ;;  %p1622_p4 = scmp.lt.u32.totalorder %s1614_s29, %s2372_s6 }
 0x2b1   : > { %p1616_p12 = pnand %p1615_p8, %p2477_p3 }
 0x2b2   : > { %p1621_p1 = por %p1620_p10, %p1619_p6 }
 0x2b3   : > { %p1617_p2 = pneg %p1616_p12 }
 0x2b4   : > { %p1623_p7 = por %p1622_p4, %p1621_p1 }
 0x2b6   : > { %p1624_p13 = pnand %p1623_p7, %p1617_p2 }
 0x2b8   : > { %1627 = shalt.err (!%p1624_p13)
}
 0x2b9   : > { %s1738_s12 = smov 64  }
 0x2ba   : > { %1307 = dma.vmem_to_hbm [thread:$0]  (%p2477_p3), %s2367_s1, 1024, %s2372_s6, %s2378_s23, %s1738_s12, %s1738_s12, %s1734_s27  }
 0x2bb PF: > { %s2478_s9 = sld [smem:[#allocation12_spill]]  ;;  %s2479_s11 = sld [smem:[#allocation14_spill]] }
 0x2bc   : > { %p1329_p9 = scmp.ge.s32.totalorder %s1726_s22, 2 }
 0x2c1   : > { %s1073_s18 = sand.u32 1, %s2478_s9   ;;  %p2480_p11 = scmp.ne.s32.totalorder %s2479_s11, 0 }
 0x2c2   : > { %s1074_s19 = scalar_lea.sflag [#allocation4], %s1073_s18 }
 0x2c3   : > { %p1321_p0 = pnand %p1329_p9, %p2480_p11 }
 0x2c5   : > { %1681 = dma.done.wait (!%p1321_p0), %s1074_s19, 1024  }
 0x2c6   : > { %1683 = vsyncadd (!%p1321_p0), %s1074_s19, 4294966272  ;;  %s20_s22 = sadd.s32 1, %s1726_s22   ;;  %s2481_s18 = sld [smem:[#allocation13_spill]] }
 0x2c7   : > { %p17_p5 = scmp.ge.s32.totalorder %s20_s22, 6   ;;  %s2482_s20 = sld [smem:[#allocation15_spill]] }
 0x2c8   : > { %s2483_s28 = smov %s2497_s15  ;;  %s2484_s12 = smov %s1690_s13 }
 0x2c9   : > { %s2485_s13 = smov %s1694_s14  ;;  %s2486_s14 = smov %s1938_s2 }
 0x2ca   : > { %s2487_s15 = smov %s1702_s16  ;;  %s2488_s16 = smov %s1706_s17 }
 0x2cb   : > { %s2489_s17 = smov %s1933_s10  ;;  %s2490_s19 = smov %s1722_s21 }
 0x2cc   : > { %s2491_s21 = smov %s2483_s28  ;;  %19 = sbr.rel (!%p17_p5) target bundleno = 13 (0xd), region = 86 }
 0x2d3   :  { %1079 = vsyncpa [#allocation3], 1 }
 0x2d4   :  { %1081 = vsyncpa [#allocation3 + $0x1], 1 }
 0x2d5   :  { %1082 = vsyncpa [#allocation6], 1 }
 0x2d6   :  { %1083 = vsyncpa [#allocation4], 1 }
 0x2d7   :  { %1085 = vsyncpa [#allocation4 + $0x1], 1 }

</bundles_post_ra>
